<compile_context>
chip_gen: v7x
topology: tpu7x:2x2x1
jax: 0.10.0
libtpu: 0.0.40
codegen_flags: <defaults>
</compile_context>

<pallas_src>
import functools
import math

import jax
import jax.numpy as jnp
from jax import lax
from jax.experimental import pallas as pl
from jax.experimental.pallas import tpu as pltpu


def _attn_kernel(*refs, mask_mode):
    """One (batch, head, q-tile) step: scores -> masked softmax -> context."""
    if mask_mode == "external":
        mask_ref, q_ref, k_ref, v_ref, o_ref = refs
    else:
        q_ref, k_ref, v_ref, o_ref = refs

    TL = q_ref.shape[2]
    S = k_ref.shape[3]

    q = q_ref[0, 0]                      # (TL, E), scale already folded in
    k = k_ref[0, 0]                      # (E, S)  lane-dense on S
    v = v_ref[0, 0]                      # (S, D)

    # QK^T on the MXU with f32 accumulation (operands already in compute dtype).
    scores = jnp.dot(q, k, preferred_element_type=jnp.float32)   # (TL, S) f32

    # Finite "-inf" stand-in: exp() underflows to exactly 0, but avoids
    # inf-inf NaNs on padded query rows of a ragged last q-tile.
    neg = jnp.float32(-1e30)
    if mask_mode == "causal":
        row0 = pl.program_id(2) * TL
        row = row0 + lax.broadcasted_iota(jnp.int32, (TL, S), 0)
        col = lax.broadcasted_iota(jnp.int32, (TL, S), 1)
        scores = jnp.where(col > row, neg, scores)
    elif mask_mode == "external":
        scores = jnp.where(mask_ref[0] != 0, neg, scores)

    # Numerically stable softmax over the key axis, all in f32.
    m = jnp.max(scores, axis=-1, keepdims=True)
    p = jnp.exp(scores - m)
    attn = p / jnp.sum(p, axis=-1, keepdims=True)

    # Context matmul: bf16 operands, f32 accumulation.
    ctx = jnp.dot(attn.astype(v.dtype), v, preferred_element_type=jnp.float32)
    o_ref[0, 0] = ctx.astype(o_ref.dtype)


def _q_tile(L):
    """Query-row tile: prefer an exact divisor (multiple of 8), cap at 128."""
    if L <= 128:
        return L
    for t in (128, 112, 96, 80, 64, 48, 32, 16, 8):
        if L % t == 0:
            return t
    return 128  # last tile is padded; out-of-bounds query rows are dropped


def _vmem_limit_bytes(working_set_bytes):
    """Generation-aware VMEM budget: <= half of this core's physical VMEM."""
    try:
        cap = int(pltpu.get_tpu_info().vmem_capacity_bytes)
    except Exception:
        cap = 64 * 1024 * 1024            # conservative (v7x per-core size)
    want = max(32 * 1024 * 1024, 3 * int(working_set_bytes))
    return int(min(want, cap // 2))


def full_attention(queries, keys, values, attn_mask=None, tau=None, delta=None,
                   *, scale=None, mask_flag=True, compute_dtype=jnp.bfloat16):
    """Pallas port of FullAttention.forward (output_attention=False).

    queries: (B, L, H, E), keys: (B, S, H, E), values: (B, S, H, D).
    Returns (V, None) with V of shape (B, L, H, D).
    """
    del tau, delta  # unused by FullAttention
    B, L, H, E = queries.shape
    _, S, _, D = values.shape
    scale = float(scale) if scale is not None else 1.0 / math.sqrt(E)
    out_dtype = queries.dtype
    cdt = jnp.dtype(compute_dtype) if compute_dtype is not None else out_dtype

    # One-time head-major layouts (single XLA transpose each, amortized over
    # the whole grid).  Scale folded into Q in f32 before the operand cast.
    q_hm = (jnp.transpose(queries, (0, 2, 1, 3)) * scale).astype(cdt)  # (B,H,L,E)
    k_hm = jnp.transpose(keys, (0, 2, 3, 1)).astype(cdt)               # (B,H,E,S)
    v_hm = jnp.transpose(values, (0, 2, 1, 3)).astype(cdt)             # (B,H,S,D)

    TL = _q_tile(L)
    QT = pl.cdiv(L, TL)

    args = [q_hm, k_hm, v_hm]
    in_specs = [
        pl.BlockSpec((1, 1, TL, E), lambda b, h, qi: (b, h, qi, 0)),
        pl.BlockSpec((1, 1, E, S), lambda b, h, qi: (b, h, 0, 0)),
        pl.BlockSpec((1, 1, S, D), lambda b, h, qi: (b, h, 0, 0)),
    ]

    mask_mode = "none"
    mask_bytes = 0
    if mask_flag:
        if attn_mask is None:
            mask_mode = "causal"          # TriangularCausalMask built in-kernel
        else:
            mask_mode = "external"
            m = jnp.asarray(attn_mask)
            if m.ndim == 4:               # PyTorch mask shape (B, 1, L, S)
                m = m[:, 0]
            elif m.ndim == 2:
                m = m[None]
            m = m.astype(jnp.int8)        # (Bm, L, S), Bm in {1, B}
            Bm = m.shape[0]
            args = [m] + args
            in_specs = [pl.BlockSpec(
                (1, TL, S),
                lambda b, h, qi: ((b if Bm == B else 0), qi, 0))] + in_specs
            mask_bytes = TL * S

    kernel = functools.partial(_attn_kernel, mask_mode=mask_mode)

    # Steady-state working set: double-buffered blocks + f32 score temps.
    blk = ((TL * E + E * S + S * D) * cdt.itemsize
           + TL * D * out_dtype.itemsize + mask_bytes)
    temps = 4 * TL * S * 4
    vmem_limit = _vmem_limit_bytes(2 * blk + temps)

    out_hm = pl.pallas_call(
        kernel,
        out_shape=jax.ShapeDtypeStruct((B, H, L, D), out_dtype),
        grid=(B, H, QT),
        in_specs=in_specs,
        out_specs=pl.BlockSpec((1, 1, TL, D), lambda b, h, qi: (b, h, qi, 0)),
        compiler_params=pltpu.CompilerParams(
            dimension_semantics=("parallel", "parallel", "parallel"),
            vmem_limit_bytes=vmem_limit),
    )(*args)

    # Single transpose back to the PyTorch (B, L, H, D) layout.
    V = jnp.transpose(out_hm, (0, 2, 1, 3))
    return V, None


def _reference(queries, keys, values, attn_mask=None, *, scale=None,
               mask_flag=True, compute_dtype=None):
    """Pure-JAX FullAttention reference.

    compute_dtype=None  -> full f32 (HIGHEST precision) reference.
    compute_dtype=bf16  -> mimics the kernel's operand casts (tight compare).
    """
    B, L, H, E = queries.shape
    _, S, _, D = values.shape
    scale = float(scale) if scale is not None else 1.0 / math.sqrt(E)

    if compute_dtype is None:
        scores = scale * jnp.einsum('blhe,bshe->bhls', queries, keys,
                                    precision=lax.Precision.HIGHEST)
        a_dtype, v_in, prec = jnp.float32, values, lax.Precision.HIGHEST
    else:
        cdt = jnp.dtype(compute_dtype)
        scores = jnp.einsum('blhe,bshe->bhls',
                            (queries * scale).astype(cdt), keys.astype(cdt),
                            preferred_element_type=jnp.float32)
        a_dtype, v_in, prec = cdt, values.astype(cdt), None

    if mask_flag:
        if attn_mask is None:
            mask = jnp.triu(jnp.ones((L, S), dtype=bool), k=1)[None, None]
        else:
            mask = jnp.asarray(attn_mask).astype(bool)
            if mask.ndim == 2:
                mask = mask[None, None]
            elif mask.ndim == 3:
                mask = mask[:, None]
        scores = jnp.where(mask, -jnp.inf, scores)

    A = jax.nn.softmax(scores, axis=-1)
    V = jnp.einsum('bhls,bshd->blhd', A.astype(a_dtype), v_in,
                   preferred_element_type=jnp.float32, precision=prec)
    return V.astype(queries.dtype)


if __name__ == "__main__":
    key = jax.random.PRNGKey(0)

    # Small shapes consistent with FullAttention inputs (B, L, H, E)/(B, S, H, D).
    B, L, H, E, D = 2, 8, 4, 32, 32
    S = L                                  # causal mask requires S == L
    kq, kk, kv = jax.random.split(key, 3)
    queries = jax.random.normal(kq, (B, L, H, E), dtype=jnp.float32)
    keys = jax.random.normal(kk, (B, S, H, E), dtype=jnp.float32)
    values = jax.random.normal(kv, (B, S, H, D), dtype=jnp.float32)

    CD = jnp.bfloat16                      # MXU operand dtype used by the kernel
    TIGHT = dict(atol=1e-2, rtol=1e-2)     # vs reference with the same operand dtype
    LOOSE = dict(atol=1e-1, rtol=1e-1)     # vs full-f32 reference (bf16 operand error)

    # 1) default path: mask_flag=True, attn_mask=None -> in-kernel causal mask.
    V1, A1 = full_attention(queries, keys, values)
    V1 = jax.block_until_ready(V1)
    assert A1 is None and V1.shape == (B, L, H, D)
    ref1_cd = _reference(queries, keys, values, compute_dtype=CD)
    ref1_f32 = _reference(queries, keys, values)
    assert jnp.allclose(V1, ref1_cd, **TIGHT), "mismatch (causal, matched dtype)"
    assert jnp.allclose(V1, ref1_f32, **LOOSE), "mismatch (causal, f32 ref)"

    # 2) explicit attn_mask path (PyTorch TriangularCausalMask shape (B,1,L,S)).
    ext = jnp.triu(jnp.ones((B, 1, L, S), dtype=bool), k=1)
    V2, _ = full_attention(queries, keys, values, attn_mask=ext)
    V2 = jax.block_until_ready(V2)
    assert jnp.allclose(V2, ref1_cd, **TIGHT), "mismatch (external mask)"

    # 3) no mask.
    V3, _ = full_attention(queries, keys, values, mask_flag=False)
    V3 = jax.block_until_ready(V3)
    ref3_cd = _reference(queries, keys, values, mask_flag=False, compute_dtype=CD)
    assert jnp.allclose(V3, ref3_cd, **TIGHT), "mismatch (no mask)"

    # 4) multi-q-tile causal path (L > 128 exercises the qi*TL row offset).
    B2, L2, H2, E2, D2 = 1, 256, 2, 32, 32
    kq2, kk2, kv2 = jax.random.split(jax.random.PRNGKey(1), 3)
    q2 = jax.random.normal(kq2, (B2, L2, H2, E2), dtype=jnp.float32)
    k2 = jax.random.normal(kk2, (B2, L2, H2, E2), dtype=jnp.float32)
    v2 = jax.random.normal(kv2, (B2, L2, H2, D2), dtype=jnp.float32)
    V4, _ = full_attention(q2, k2, v2)
    V4 = jax.block_until_ready(V4)
    ref4_cd = _reference(q2, k2, v2, compute_dtype=CD)
    assert jnp.allclose(V4, ref4_cd, **TIGHT), "mismatch (tiled causal)"

    print("KERNEL_OK")
</pallas_src>

<mosaic_0001>
module attributes {stable_mosaic.version = 11 : i64} {
  func.func @_attn_kernel(%arg0: i32, %arg1: i32, %arg2: i32, %arg3: memref<1x1x8x32xbf16, #tpu.memory_space<vmem>>, %arg4: memref<1x1x32x8xbf16, #tpu.memory_space<vmem>>, %arg5: memref<1x1x8x32xbf16, #tpu.memory_space<vmem>>, %arg6: memref<1x1x8x32xf32, #tpu.memory_space<vmem>>) attributes {dimension_semantics = [#tpu.dimension_semantics<parallel>, #tpu.dimension_semantics<parallel>, #tpu.dimension_semantics<parallel>], iteration_bounds = array<i64: 2, 4, 1>, scalar_prefetch = 0 : i64, scratch_operands = 0 : i64, tpu.core_type = #tpu.core_type<tc>, window_params = [{transform_indices = @transform_0, window_bounds = array<i64: 1, 1, 8, 32>}, {transform_indices = @transform_1, window_bounds = array<i64: 1, 1, 32, 8>}, {transform_indices = @transform_2, window_bounds = array<i64: 1, 1, 8, 32>}, {transform_indices = @transform_3, window_bounds = array<i64: 1, 1, 8, 32>}]} {
    %c0 = arith.constant 0 : index
    %c0_0 = arith.constant 0 : index
    %c0_1 = arith.constant 0 : index
    %c0_2 = arith.constant 0 : index
    %0 = vector.load %arg3[%c0, %c0_0, %c0_1, %c0_2] : memref<1x1x8x32xbf16, #tpu.memory_space<vmem>>, vector<1x1x8x32xbf16>
    %1 = vector.shape_cast %0 : vector<1x1x8x32xbf16> to vector<8x32xbf16>
    %c0_3 = arith.constant 0 : index
    %c0_4 = arith.constant 0 : index
    %c0_5 = arith.constant 0 : index
    %c0_6 = arith.constant 0 : index
    %2 = vector.load %arg4[%c0_3, %c0_4, %c0_5, %c0_6] : memref<1x1x32x8xbf16, #tpu.memory_space<vmem>>, vector<1x1x32x8xbf16>
    %3 = vector.shape_cast %2 : vector<1x1x32x8xbf16> to vector<32x8xbf16>
    %c0_7 = arith.constant 0 : index
    %c0_8 = arith.constant 0 : index
    %c0_9 = arith.constant 0 : index
    %c0_10 = arith.constant 0 : index
    %4 = vector.load %arg5[%c0_7, %c0_8, %c0_9, %c0_10] : memref<1x1x8x32xbf16, #tpu.memory_space<vmem>>, vector<1x1x8x32xbf16>
    %5 = vector.shape_cast %4 : vector<1x1x8x32xbf16> to vector<8x32xbf16>
    %cst = arith.constant dense<0.000000e+00> : vector<8x8xf32>
    %6 = tpu.matmul %1, %3, %cst {dimension_numbers = #tpu.dot_dimension_numbers<[1], [0], [0], [1], [0, 0, 1, 1], [], []>} : vector<8x32xbf16>, vector<32x8xbf16>, vector<8x8xf32> -> vector<8x8xf32>
    %c8_i32 = arith.constant 8 : i32
    %7 = arith.muli %arg2, %c8_i32 : i32
    %8 = tpu.iota {dimensions = array<i32: 0>} : vector<8x8xi32>
    %9 = vector.broadcast %7 : i32 to vector<8x8xi32>
    %10 = arith.addi %9, %8 : vector<8x8xi32>
    %11 = tpu.iota {dimensions = array<i32: 1>} : vector<8x8xi32>
    %12 = arith.cmpi sgt, %11, %10 : vector<8x8xi32>
    %cst_11 = arith.constant -1.000000e+30 : f32
    %13 = vector.broadcast %cst_11 : f32 to vector<8x8xf32>
    %14 = arith.select %12, %13, %6 : vector<8x8xi1>, vector<8x8xf32>
    %cst_12 = arith.constant dense<0xFF800000> : vector<8xf32>
    %15 = vector.multi_reduction <maximumf>, %14, %cst_12 [1] : vector<8x8xf32> to vector<8xf32>
    %16 = vector.shape_cast %15 : vector<8xf32> to vector<8x1xf32>
    %17 = vector.broadcast %16 : vector<8x1xf32> to vector<8x8xf32>
    %18 = arith.subf %14, %17 : vector<8x8xf32>
    %19 = math.exp %18 : vector<8x8xf32>
    %cst_13 = arith.constant dense<0.000000e+00> : vector<8xf32>
    %20 = vector.multi_reduction <add>, %19, %cst_13 [1] : vector<8x8xf32> to vector<8xf32>
    %21 = vector.shape_cast %20 : vector<8xf32> to vector<8x1xf32>
    %22 = vector.broadcast %21 : vector<8x1xf32> to vector<8x8xf32>
    %23 = arith.divf %19, %22 : vector<8x8xf32>
    %24 = arith.truncf %23 : vector<8x8xf32> to vector<8x8xbf16>
    %cst_14 = arith.constant dense<0.000000e+00> : vector<8x32xf32>
    %25 = tpu.matmul %24, %5, %cst_14 {dimension_numbers = #tpu.dot_dimension_numbers<[1], [0], [0], [1], [0, 0, 1, 1], [], []>} : vector<8x8xbf16>, vector<8x32xbf16>, vector<8x32xf32> -> vector<8x32xf32>
    %c0_15 = arith.constant 0 : index
    %c0_16 = arith.constant 0 : index
    %c0_17 = arith.constant 0 : index
    %c0_18 = arith.constant 0 : index
    %26 = vector.load %arg6[%c0_15, %c0_16, %c0_17, %c0_18] : memref<1x1x8x32xf32, #tpu.memory_space<vmem>>, vector<1x1x8x32xf32>
    %27 = vector.shape_cast %26 : vector<1x1x8x32xf32> to vector<8x32xf32>
    %28 = vector.shape_cast %25 : vector<8x32xf32> to vector<1x1x8x32xf32>
    tpu.vector_store %arg6[%c0_15, %c0_16, %c0_17, %c0_18], %28 {strides = array<i32>} : memref<1x1x8x32xf32, #tpu.memory_space<vmem>>, vector<1x1x8x32xf32>,
    return
  }
  func.func @transform_0(%arg0: i32, %arg1: i32, %arg2: i32) -> (i32, i32, i32, i32) {
    %c0_i32 = arith.constant 0 : i32
    %c0_i32_0 = arith.constant 0 : i32
    return %arg0, %arg1, %arg2, %c0_i32 : i32, i32, i32, i32
  }
  func.func @transform_1(%arg0: i32, %arg1: i32, %arg2: i32) -> (i32, i32, i32, i32) {
    %c0_i32 = arith.constant 0 : i32
    %c0_i32_0 = arith.constant 0 : i32
    %c0_i32_1 = arith.constant 0 : i32
    return %arg0, %arg1, %c0_i32, %c0_i32_0 : i32, i32, i32, i32
  }
  func.func @transform_2(%arg0: i32, %arg1: i32, %arg2: i32) -> (i32, i32, i32, i32) {
    %c0_i32 = arith.constant 0 : i32
    %c0_i32_0 = arith.constant 0 : i32
    %c0_i32_1 = arith.constant 0 : i32
    return %arg0, %arg1, %c0_i32, %c0_i32_0 : i32, i32, i32, i32
  }
  func.func @transform_3(%arg0: i32, %arg1: i32, %arg2: i32) -> (i32, i32, i32, i32) {
    %c0_i32 = arith.constant 0 : i32
    %c0_i32_0 = arith.constant 0 : i32
    return %arg0, %arg1, %arg2, %c0_i32 : i32, i32, i32, i32
  }
}

</mosaic_0001>

<bundles_post_ra>
// kernel: tpu_custom_call.1
= control target key start
LH: loop header
LB: loop body
LE: loop exit
PB: predicated region body
PF: predicated region fallthrough
CT: control target
= control target key end

     0   :  { %8 = vsyncpa [#allocation3], 0  ;;  %s943_s0 = inlined_call_operand.vmem [shape: bf16[2,4,8,32], index: 0, kind: input, shape index: {}]   ;;  %s944_s1 = inlined_call_operand.vmem [shape: bf16[2,4,32,8], index: 1, kind: input, shape index: {}]   ;;  %s945_s2 = inlined_call_operand.vmem [shape: bf16[2,4,8,32], index: 2, kind: input, shape index: {}]   ;;  %s946_s3 = inlined_call_operand.hbm [shape: f32[2,4,8,32], index: 3, kind: output, shape index: {}]  }
   0x1   :  { %10 = vsyncpa [#allocation3 + $0x1], 0  ;;  %s792_s12 = smov 0   ;;  %s794_s13 = smov 0  }
   0x2   :  { %s796_s14 = smov 0   ;;  %s798_s15 = smov 0  }
   0x3   :  { %s800_s16 = smov 0   ;;  %s802_s17 = smov 0  }
   0x4   :  { %s804_s18 = smov 0   ;;  %s806_s19 = smov 0  }
   0x5 LB: > { %s553_s20 = sadd.s32 4294967295, %s767_s19   ;;  %s554_s21 = sadd.s32 4294967294, %s767_s19   ;;  %s767_s19 = sphi %s806_s19, %s16_s19   ;;  %s763_s18 = sphi %s804_s18, %s958_s18   ;;  %s759_s17 = sphi %s802_s17, %s957_s17   ;;  %s755_s16 = sphi %s800_s16, %s956_s16   ;;  %s751_s15 = sphi %s798_s15, %s955_s15   ;;  %s747_s14 = sphi %s796_s14, %s954_s14   ;;  %s743_s13 = sphi %s794_s13, %s953_s13   ;;  %s739_s12 = sphi %s792_s12, %s952_s12  }
   0x6   : > { %s31_s22 = sadd.s32 1, %s759_s17  ;;  %s35_s23 = sadd.s32 1, %s763_s18 }
   0x7   : > { %p33_p0 = scmp.ge.s32.totalorder %s31_s22, 4  ;;  %p142_p1 = scmp.ne.s32.totalorder %s747_s14, %s743_s13 }
   0x8   : > { %p143_p2 = scmp.eq.s32.totalorder %s553_s20, 7  ;;  %p148_p5 = scmp.ne.s32.totalorder %s743_s13, %s739_s12 }
   0x9   : > { %s960_s22 = smov (%p33_p0, %s31_s22), 0  ;;  %s962_s23 = smov (!%p33_p0, %s35_s23), %s763_s18 }
   0xa   : > { %s126_s24 = ssub.s32 %s759_s17, %s960_s22  ;;  %p843_p3 = por %p143_p2, %p142_p1 }
   0xb   : > { %p37_p4 = scmp.ge.s32.totalorder %s962_s23, 2  ;;  %p149_p6 = scmp.eq.s32.totalorder %s554_s21, 7 }
   0xc   : > { %p557_p7 = scmp.ge.s32.totalorder %s767_s19, 1  ;;  %p204_p9 = scmp.lt.s32.totalorder %s767_s19, 9 }
   0xd   : > { %s964_s23 = smov (%p37_p4, %s962_s23), 0  ;;  %p852_p8 = por %p149_p6, %p148_p5 }
   0xe   : > { %949 = sst [smem:[#allocation5_spill]] %s964_s23  ;;  %s125_s27 = ssub.s32 %s763_s18, %s964_s23 }
   0xf   : > { %s132_s28 = sadd.s32 1, %s747_s14  ;;  %s127_s29 = sor.u32 %s126_s24, %s125_s27 }
  0x10   : > { %p205_p10 = pnand %p557_p7, %p204_p9  ;;  %p130_p11 = scmp.eq.s32.totalorder %s127_s29, 0 }
  0x11   : > { %p251_p12 = scmp.lt.s32.totalorder (!%p205_p10), %s755_s16, 1  ;;  %p253_p13 = scmp.lt.s32.totalorder (!%p205_p10), %s751_s15, 3  ;;  %v769_v0 = vmov (!%p205_p10), 0.0   ;;  %vm770_vm0 = vmmov (!%p205_p10), 0   ;;  %vm298_vm1 = vcmask (!%p205_p10), 261120   ;;  %v343_v4 = vlaneseq (!%p205_p10) }
  0x12   : > { %s861_s30 = scalar_select %p130_p11, %s747_s14, %s132_s28  }
  0x13   : > { %208 = sbr.rel (%p205_p10) target bundleno = 797 (0x31d), region = 32  ;;  %580 = vmatprep.subr.bf16.mxu0 (!%p205_p10), %v769_v0  ;;  %584 = vmatprep.mubr.msk.bf16.mxu0 (!%p205_p10), %vm770_vm0, %v769_v0  ;;  %v344_v5 = vshrl.u32 (!%p205_p10), %v343_v4, 7  ;;  %v348_v6 = vand.u32 (!%p205_p10), 127, %v343_v4  ;;  %vm351_vm3 = vcmask (!%p205_p10), 64512   ;;  %vm367_vm4 = vcmask (!%p205_p10), 1043456   ;;  %s771_s28 = smov (!%p205_p10), [#allocation2]  }
  0x14   : > { %588 = vmatprep.subr.bf16.mxu1 (!%p205_p10), %v769_v0  ;;  %590 = vmatprep.mubr.msk.bf16.mxu1 (!%p205_p10), %vm770_vm0, %v769_v0  ;;  %s677_s29 = sshll.u32 (!%p205_p10), %s771_s28, 4  ;;  %s678_s29 = int_to_ptr.vmem [resolvable:$false] %s677_s29 }
  0x15   : > { %vm349_vm2 = vcmp.gt.s32.totalorder (!%p205_p10), %v348_v6, %v344_v5 }
  0x1a   : > { %s252_s4 = scalar_select %p251_p12, %s755_s16, 1 }
  0x1b   : > { %s254_s5 = scalar_select %p253_p13, %s751_s15, 3 }
  0x1c   : > { %s562_s6 = sshll.u32 %s252_s4, 4  ;;  %s559_s7 = sshll.u32 %s252_s4, 2 }
  0x1d   : > { %s561_s8 = sshll.u32 %s254_s5, 2  ;;  %s867_s10 = sadd.s32 %s559_s7, %s254_s5 }
  0x1e   : > { %s268_s9 = sadd.s32 %s562_s6, %s561_s8  ;;  %s560_s27 = sshll.u32 %s867_s10, 2 }
  0x1f   : > { %s563_s11 = sshll.u32 %s268_s9, 2  ;;  %s261_s23 = scalar_lea.vmem %s943_s0, %s560_s27 }
  0x20   : > { %s270_s24 = scalar_lea.vmem %s944_s1, %s563_s11  ;;  %v280_v3 = vld [vmem:[%s261_s23] sm:$0xf]  ;;  %s278_s5 = scalar_lea.vmem %s945_s2, %s560_s27 }
  0x21   : > { %v667_v1 = vld [vmem:[%s270_s24] sm:$0xff]   ;;  %v668_v2 = vld [vmem:[%s270_s24 + $0x8] sm:$0xff]   ;;  %s248_s6 = sand.u32 1, %s743_s13   ;;  %s571_s8 = sshll.u32 %s755_s16, 2 }
  0x22   : > { %581 = vmatpush3.bf16.msra.mxu0 %v667_v1  ;;  %v285_v18 = vld [vmem:[%s278_s5] sm:$0xf]  ;;  %s558_s7 = sshll.u32 %s248_s6, 3  ;;  %s425_s9 = sadd.s32 %s751_s15, %s571_s8 }
  0x23   : > { %582 = vmatprep.subr.bf16.mxu0 %v769_v0  ;;  %v369_v19 = vsel %vm367_vm4, %v285_v18, 0  ;;  %s572_s10 = sshll.u32 %s425_s9, 7  ;;  %s250_s11 = scalar_lea.vmem [#allocation2], %s558_s7 }
  0x24   : > { %589 = vmatpush3.bf16.msra.mxu1 %v369_v19  ;;  %s429_s20 = sshll.u32 %s250_s11, 4  ;;  %s889_s27 = scalar_lea.hbm %s946_s3, %s572_s10  ;;  %s891_s20 = int_to_ptr.vmem [resolvable:$true] %s429_s20 }
  0x25   : > { %s413_s16 = scalar_lea.sflag [#allocation3], %s248_s6  ;;  %s673_s15 = scalar_lea.vmem %s891_s20, 128 }
  0x26   : > { %583 = vmatpush3.bf16.msra.mxu0 %v668_v2  ;;  %p674_p0 = scmp.ne.s32.totalorder %s891_s20, %s673_s15  ;;  %s679_s23 = scalar_lea.vmem %s678_s29, 256 }
  0x27   : > { %p680_p4 = scmp.lt.s32.totalorder %s891_s20, %s678_s29  ;;  %p681_p5 = scmp.lt.s32.totalorder %s679_s23, %s673_s15 }
  0x28   : > { %p675_p1 = pnand %p674_p0, %p843_p3 }
  0x29   : > { %585 = vmatmul.mubr.msk.bf16.vlgmr.msra.gmra.mrb[0].mxu0 %vm298_vm1, %v280_v3  ;;  %p682_p6 = por %p681_p5, %p680_p4 }
  0x2a   : > { %p676_p2 = pneg %p675_p1 }
  0x2c   : > { %p683_p7 = pnand %p682_p6, %p676_p2 }
  0xfc   : > { %v336_v7 = vpop.f32.mrb[0].mxu0 }
  0xfd   : > { %v350_v8 = vsel %vm349_vm2, -1e+30, %v336_v7  ;;  %v586_v9 = vpop.f32.mrb[1].mxu0 }
  0xfe   : > { %v339_v10 = vpop.f32.mrb[2].mxu0  ;;  %v352_v11 = vsel %vm351_vm3, %v350_v8, -inf }
  0xff   : > { %353 = vmax.xlane.f32.xlu0 %v352_v11  ;;  %v587_v12 = vpop.f32.mrb[3].mxu0 }
 0x18c   : > { %v354_v13 = vpop.xlane.xlu0 %353 }
 0x18d   : > { %v355_v14 = vsub.f32 %v350_v8, %v354_v13 }
 0x18f   : > { %v356_v15 = vmul.f32 1.442695, %v355_v14 }
 0x191   : > { %669 = vpow2.f32 %v356_v15 }
 0x19b   : > { %v670_v16 = vpop.eup %669 }
 0x19c   : > { %v358_v17 = vsel %vm351_vm3, %v670_v16, 0.0 }
 0x19d   : > { %359 = vadd.xlane.f32.xlu0 %v358_v17 }
 0x22a   : > { %v360_v20 = vpop.xlane.xlu0 %359 }
 0x22b   : > { %671 = vrcp.f32 %v360_v20 }
 0x235   : > { %v672_v21 = vpop.eup %671 }
 0x236   : > { %v362_v22 = vmul.f32 %v672_v21, %v670_v16 }
 0x238   : > { %v363_v23 = vpack.c.bf16 %v362_v22, %v362_v22 }
 0x23a   : > { %591 = vmatmul.mubr.msk.bf16.vlgmr.msra.gmra.mrb[0].mxu1 %vm351_vm3, %v363_v23 }
 0x30d   : > { %v405_v24 = vpop.f32.mrb[0].mxu1 }
 0x30e   : > { %411 = vst.msk [vmem:[%s250_s11] sm:$0xff] %vm298_vm1, %v405_v24  ;;  %v592_v25 = vpop.f32.mrb[1].mxu1 }
 0x30f   : > { %v408_v26 = vpop.f32.mrb[2].mxu1 }
 0x310   : > { %686 = shalt.err (!%p683_p7)
}
 0x311   : > { %s687_s4 = scalar_lea.hbm %s889_s27, 128  ;;  %s691_s7 = scalar_lea.hbm %s946_s3, 1024 }
 0x312   : > { %p688_p9 = scmp.ne.s32.totalorder %s889_s27, %s687_s4  ;;  %p692_p12 = scmp.lt.u32.totalorder %s889_s27, %s946_s3 }
 0x313   : > { %p693_p13 = scmp.lt.u32.totalorder %s691_s7, %s687_s4  ;;  %p695_p1 = scmp.lt.u32.totalorder %s687_s4, %s889_s27 }
 0x314   : > { %p689_p10 = pnand %p688_p9, %p843_p3 }
 0x315   : > { %p694_p0 = por %p693_p13, %p692_p12 }
 0x316   : > { %p690_p11 = pneg %p689_p10 }
 0x317   : > { %p696_p2 = por %p695_p1, %p694_p0 }
 0x319   : > { %p697_p4 = pnand %p696_p2, %p690_p11 }
 0x31b   : > { %700 = shalt.err (!%p697_p4)
}
 0x31c   : > { %594 = dma.vmem_to_hbm [thread:$0]  (%p843_p3), %s891_s20, 128, %s889_s27, %s413_s16   ;;  %v593_v27 = vpop.f32.mrb[3].mxu1 }
 0x31d PF: > { %p600_p5 = scmp.ge.s32.totalorder %s767_s19, 2  ;;  %s441_s10 = sand.u32 1, %s739_s12  }
 0x31e   : > { %s442_s11 = scalar_lea.sflag [#allocation3], %s441_s10 }
 0x31f   : > { %p597_p6 = pnand %p600_p5, %p852_p8 }
 0x321   : > { %734 = dma.done.wait (!%p597_p6), %s442_s11, 128  }
 0x322   : > { %736 = vsyncadd (!%p597_p6), %s442_s11, 4294967168  ;;  %s16_s19 = sadd.s32 1, %s767_s19   ;;  %s951_s25 = sld [smem:[#allocation5_spill]] }
 0x323   : > { %p13_p7 = scmp.ge.s32.totalorder %s16_s19, 10   ;;  %s952_s12 = smov %s743_s13 }
 0x324   : > { %s953_s13 = smov %s747_s14  ;;  %s954_s14 = smov %s861_s30 }
 0x325   : > { %s955_s15 = smov %s759_s17  ;;  %s956_s16 = smov %s763_s18 }
 0x326   : > { %s957_s17 = smov %s960_s22  ;;  %15 = sbr.rel (!%p13_p7) target bundleno = 5 (0x5), region = 73 }
 0x328   : > { %s958_s18 = smov %s951_s25 }
 0x32d   :  { %447 = vsyncpa [#allocation3], 1 }
 0x32e   :  { %449 = vsyncpa [#allocation3 + $0x1], 1 }

</bundles_post_ra>
